<compile_context>
chip_gen: v6e
topology: v6e:2x2x1
jax: 0.10.0
libtpu: 0.0.40
codegen_flags: <defaults>
</compile_context>

<pallas_src>
import functools

import jax
import jax.numpy as jnp
from jax import lax
from jax.experimental import pallas as pl
from jax.experimental.pallas import tpu as pltpu

ALPHA = 1e-12  # GaussianDecoder.alpha
LANE = 128     # TPU lane width


def _round_up(x, m):
    return ((x + m - 1) // m) * m


def _fused_decoder_kernel(z_ref, w1, b1, w2, b2, w3, b3, out_ref, *, sdx):
    """One batch tile through the fused (mean || covariance) 3-layer MLP.

    z_ref : (TB, S)   f32   flattened latent tile
    w1    : (S, Hf)   bf16  [wm1 | wc1 | 0-pad]
    w2    : (Hf, Hf)  bf16  block-diag(wm2, wc2) + 0-pad
    w3    : (Hf, Nout) bf16 wm3 -> cols [0,SDx), wc3 -> cols [SDx,2SDx)
    b*    : (1, *)    f32   fused biases (added after f32 accumulation)
    out   : (TB, Nout) f32  cols [0,SDx) = mu, cols [SDx,2SDx) = exp(logvar)+alpha
    """
    x = z_ref[...].astype(w1.dtype)

    h = jnp.dot(x, w1[...], preferred_element_type=jnp.float32) + b1[...]
    h = jnp.maximum(h, 0.0).astype(w2.dtype)
    h = jnp.dot(h, w2[...], preferred_element_type=jnp.float32) + b2[...]
    h = jnp.maximum(h, 0.0).astype(w3.dtype)
    raw = jnp.dot(h, w3[...], preferred_element_type=jnp.float32) + b3[...]

    # exp()+alpha only on the covariance lanes; mean / pad lanes pass through.
    # For the current SDx (< 128) an iota mask is cheaper than realigning the
    # var segment to a lane boundary (that would double output writeback).
    col = lax.broadcasted_iota(jnp.int32, raw.shape, 1)
    is_var = jnp.logical_and(col >= sdx, col < 2 * sdx)
    out_ref[...] = jnp.where(is_var, jnp.exp(raw) + ALPHA, raw)


def _fuse_params(params, *, sequence_length, x_dimension, inter_dim,
                 weight_dtype=jnp.bfloat16):
    """Pack the 2x3 nn.Linear params into lane-fused, 128-padded operands.

    Weights are cast to `weight_dtype` (bf16 by default: MXU-native, halves
    DMA/VMEM); biases stay f32 and are added after the f32 accumulation.
    Pad rows/columns are zero so padded output lanes stay exactly zero.
    """
    S, Dx, H = sequence_length, x_dimension, inter_dim
    SDx = S * Dx
    Hf = _round_up(2 * H, LANE)
    Nout = _round_up(2 * SDx, LANE)

    (wm1, bm1, wm2, bm2, wm3, bm3,
     wc1, bc1, wc2, bc2, wc3, bc3) = params
    f32 = jnp.float32

    w1f = jnp.zeros((S, Hf), f32).at[:, :H].set(wm1).at[:, H:2 * H].set(wc1)
    b1f = jnp.zeros((1, Hf), f32).at[:, :H].set(bm1).at[:, H:2 * H].set(bc1)

    w2f = (jnp.zeros((Hf, Hf), f32)
           .at[:H, :H].set(wm2)
           .at[H:2 * H, H:2 * H].set(wc2))
    b2f = jnp.zeros((1, Hf), f32).at[:, :H].set(bm2).at[:, H:2 * H].set(bc2)

    w3f = (jnp.zeros((Hf, Nout), f32)
           .at[:H, :SDx].set(wm3)
           .at[H:2 * H, SDx:2 * SDx].set(wc3))
    b3f = (jnp.zeros((1, Nout), f32)
           .at[:, :SDx].set(bm3)
           .at[:, SDx:2 * SDx].set(bc3))

    w1f = w1f.astype(weight_dtype)
    w2f = w2f.astype(weight_dtype)
    w3f = w3f.astype(weight_dtype)
    return (w1f, b1f, w2f, b2f, w3f, b3f), Hf, Nout


def gaussian_decoder_forward(z, params, *, sequence_length, x_dimension,
                             inter_dim, weight_dtype=jnp.bfloat16):
    """z: (B, S, 1) float32 -> (mu_x (B,S,Dx), var_x (B,S,Dx)).

    var_x is the diagonal of sigma_x = diag_embed(exp(logvar)) + alpha*I.
    The dense sigma_x is intentionally NOT materialized here (Dx-fold HBM
    write amplification); use `diag_to_dense_cov(var_x)` if a dense matrix is
    required downstream.
    """
    B, S, Dz = z.shape
    assert Dz == 1 and S == sequence_length
    Dx = x_dimension
    SDx = S * Dx

    fused, Hf, Nout = _fuse_params(
        params, sequence_length=S, x_dimension=Dx, inter_dim=inter_dim,
        weight_dtype=weight_dtype)
    w1f, b1f, w2f, b2f, w3f, b3f = fused

    # Batch tiling: big tiles (up to 1024 rows, multiple of 8 sublanes)
    # amortize per-grid-step overhead, but keep >= 2 grid steps when the batch
    # allows so v7x's second TensorCore gets work via the "parallel" axis.
    B8 = _round_up(B, 8)
    TB = max(8, min(1024, _round_up(pl.cdiv(B8, 2), 8)))
    B_pad = _round_up(B8, TB)

    z_flat = z.reshape(B, S)                     # glue: z.view(B, -1)
    if B_pad != B:
        z_flat = jnp.pad(z_flat, ((0, B_pad - B), (0, 0)))

    grid = (B_pad // TB,)
    const2d = lambda i: (0, 0)                   # weights stay VMEM-resident
    batch2d = lambda i: (i, 0)                   # batch-tiled operands

    in_specs = [
        pl.BlockSpec((TB, S), batch2d),          # z tile
        pl.BlockSpec((S, Hf), const2d),          # w1f
        pl.BlockSpec((1, Hf), const2d),          # b1f
        pl.BlockSpec((Hf, Hf), const2d),         # w2f
        pl.BlockSpec((1, Hf), const2d),          # b2f
        pl.BlockSpec((Hf, Nout), const2d),       # w3f
        pl.BlockSpec((1, Nout), const2d),        # b3f
    ]
    out_specs = pl.BlockSpec((TB, Nout), batch2d)

    out = pl.pallas_call(
        functools.partial(_fused_decoder_kernel, sdx=SDx),
        grid=grid,
        in_specs=in_specs,
        out_specs=out_specs,
        out_shape=jax.ShapeDtypeStruct((B_pad, Nout), jnp.float32),
        compiler_params=pltpu.CompilerParams(
            dimension_semantics=("parallel",),   # batch axis: megacore-friendly
        ),
    )(z_flat, w1f, b1f, w2f, b2f, w3f, b3f)

    mu_x = out[:B, :SDx].reshape(B, S, Dx)
    var_x = out[:B, SDx:2 * SDx].reshape(B, S, Dx)   # exp(logvar) + alpha

    # TODO(synk): torch.distributions.MultivariateNormal (p_theta_x) has no
    # Pallas/JAX-array equivalent; (mu_x, var_x) is its full parameterization
    # since the covariance is diagonal.
    return mu_x, var_x


def diag_to_dense_cov(var_x):
    """diag_embed(exp(logvar)) + alpha*I == diag(var_x). Layout glue only —
    build it lazily/downstream; do not route it through HBM unnecessarily."""
    Dx = var_x.shape[-1]
    return var_x[..., :, None] * jnp.eye(Dx, dtype=var_x.dtype)


def init_params(key, sequence_length, x_dimension, inter_dim):
    """Deterministic init of both MLPs (weights stored as (in, out))."""
    S, Dx, H = sequence_length, x_dimension, inter_dim
    dims = [(S, H), (H, H), (H, S * Dx)]
    params = []
    for _mlp_idx in range(2):  # 0: mean, 1: covariance
        for din, dout in dims:
            key, k_w, k_b = jax.random.split(key, 3)
            scale = 1.0 / jnp.sqrt(jnp.float32(din))
            w = jax.random.uniform(k_w, (din, dout), jnp.float32, -scale, scale)
            b = jax.random.uniform(k_b, (1, dout), jnp.float32, -scale, scale)
            params += [w, b]
    return params


def reference_forward(z, params, *, sequence_length, x_dimension):
    """Plain-JAX f32 reference (unfused, mirrors the PyTorch module)."""
    B, S, _ = z.shape
    x = z.reshape(B, S)
    (wm1, bm1, wm2, bm2, wm3, bm3,
     wc1, bc1, wc2, bc2, wc3, bc3) = params
    h = jnp.maximum(x @ wm1 + bm1, 0.0)
    h = jnp.maximum(h @ wm2 + bm2, 0.0)
    mu = (h @ wm3 + bm3).reshape(B, S, x_dimension)
    g = jnp.maximum(x @ wc1 + bc1, 0.0)
    g = jnp.maximum(g @ wc2 + bc2, 0.0)
    logvar = (g @ wc3 + bc3).reshape(B, S, x_dimension)
    var = jnp.exp(logvar) + ALPHA
    sigma = var[..., :, None] * jnp.eye(x_dimension, dtype=var.dtype)
    return mu, sigma


if __name__ == "__main__":
    B, S, Dx, Dz, H = 2, 8, 4, 1, 32

    key = jax.random.PRNGKey(0)
    key, kz = jax.random.split(key)
    z = jax.random.normal(kz, (B, S, Dz), dtype=jnp.float32)

    params = init_params(key, S, Dx, H)

    mu_x, var_x = gaussian_decoder_forward(
        z, params, sequence_length=S, x_dimension=Dx, inter_dim=H
    )
    jax.block_until_ready((mu_x, var_x))

    mu_ref, sigma_ref = reference_forward(
        z, params, sequence_length=S, x_dimension=Dx
    )
    var_ref = jnp.diagonal(sigma_ref, axis1=-2, axis2=-1)

    assert mu_x.shape == (B, S, Dx)
    assert var_x.shape == (B, S, Dx)
    # Weights run in bf16 on the MXU (f32 accumulation) -> loosened tolerance
    # vs. the f32 reference.
    assert jnp.allclose(mu_x, mu_ref, atol=2e-2, rtol=2e-2)
    assert jnp.allclose(var_x, var_ref, atol=2e-2, rtol=2e-2)

    # Dense sigma_x only for the compatibility check at tiny scale.
    sigma_x = diag_to_dense_cov(var_x)
    assert sigma_x.shape == (B, S, Dx, Dx)
    assert jnp.allclose(sigma_x, sigma_ref, atol=2e-2, rtol=2e-2)

    print("KERNEL_OK")
</pallas_src>

<mosaic_0001>
module attributes {stable_mosaic.version = 11 : i64} {
  func.func @_fused_decoder_kernel(%arg0: i32, %arg1: memref<8x8xf32, #tpu.memory_space<vmem>>, %arg2: memref<8x128xbf16, #tpu.memory_space<vmem>>, %arg3: memref<1x128xf32, #tpu.memory_space<vmem>>, %arg4: memref<128x128xbf16, #tpu.memory_space<vmem>>, %arg5: memref<1x128xf32, #tpu.memory_space<vmem>>, %arg6: memref<128x128xbf16, #tpu.memory_space<vmem>>, %arg7: memref<1x128xf32, #tpu.memory_space<vmem>>, %arg8: memref<8x128xf32, #tpu.memory_space<vmem>>) attributes {dimension_semantics = [#tpu.dimension_semantics<parallel>], iteration_bounds = array<i64: 1>, scalar_prefetch = 0 : i64, scratch_operands = 0 : i64, tpu.core_type = #tpu.core_type<tc>, window_params = [{transform_indices = @transform_0, window_bounds = array<i64: 8, 8>}, {pipeline_mode = #tpu.pipeline_mode<synchronous>, transform_indices = @transform_1, window_bounds = array<i64: 8, 128>}, {pipeline_mode = #tpu.pipeline_mode<synchronous>, transform_indices = @transform_2, window_bounds = array<i64: 1, 128>}, {pipeline_mode = #tpu.pipeline_mode<synchronous>, transform_indices = @transform_3, window_bounds = array<i64: 128, 128>}, {pipeline_mode = #tpu.pipeline_mode<synchronous>, transform_indices = @transform_4, window_bounds = array<i64: 1, 128>}, {pipeline_mode = #tpu.pipeline_mode<synchronous>, transform_indices = @transform_5, window_bounds = array<i64: 128, 128>}, {pipeline_mode = #tpu.pipeline_mode<synchronous>, transform_indices = @transform_6, window_bounds = array<i64: 1, 128>}, {transform_indices = @transform_7, window_bounds = array<i64: 8, 128>}]} {
    %c0 = arith.constant 0 : index
    %c0_0 = arith.constant 0 : index
    %0 = vector.load %arg1[%c0, %c0_0] : memref<8x8xf32, #tpu.memory_space<vmem>>, vector<8x8xf32>
    %1 = arith.truncf %0 : vector<8x8xf32> to vector<8x8xbf16>
    %c0_1 = arith.constant 0 : index
    %c0_2 = arith.constant 0 : index
    %2 = vector.load %arg2[%c0_1, %c0_2] : memref<8x128xbf16, #tpu.memory_space<vmem>>, vector<8x128xbf16>
    %cst = arith.constant dense<0.000000e+00> : vector<8x128xf32>
    %3 = tpu.matmul %1, %2, %cst {dimension_numbers = #tpu.dot_dimension_numbers<[1], [0], [0], [1], [0, 0, 1, 1], [], []>} : vector<8x8xbf16>, vector<8x128xbf16>, vector<8x128xf32> -> vector<8x128xf32>
    %c0_3 = arith.constant 0 : index
    %c0_4 = arith.constant 0 : index
    %4 = vector.load %arg3[%c0_3, %c0_4] : memref<1x128xf32, #tpu.memory_space<vmem>>, vector<1x128xf32>
    %5 = vector.broadcast %4 : vector<1x128xf32> to vector<8x128xf32>
    %6 = arith.addf %3, %5 : vector<8x128xf32>
    %cst_5 = arith.constant 0.000000e+00 : f32
    %7 = vector.broadcast %cst_5 : f32 to vector<8x128xf32>
    %8 = arith.maximumf %6, %7 : vector<8x128xf32>
    %9 = arith.truncf %8 : vector<8x128xf32> to vector<8x128xbf16>
    %c0_6 = arith.constant 0 : index
    %c0_7 = arith.constant 0 : index
    %10 = vector.load %arg4[%c0_6, %c0_7] : memref<128x128xbf16, #tpu.memory_space<vmem>>, vector<128x128xbf16>
    %cst_8 = arith.constant dense<0.000000e+00> : vector<8x128xf32>
    %11 = tpu.matmul %9, %10, %cst_8 {dimension_numbers = #tpu.dot_dimension_numbers<[1], [0], [0], [1], [0, 0, 1, 1], [], []>} : vector<8x128xbf16>, vector<128x128xbf16>, vector<8x128xf32> -> vector<8x128xf32>
    %c0_9 = arith.constant 0 : index
    %c0_10 = arith.constant 0 : index
    %12 = vector.load %arg5[%c0_9, %c0_10] : memref<1x128xf32, #tpu.memory_space<vmem>>, vector<1x128xf32>
    %13 = vector.broadcast %12 : vector<1x128xf32> to vector<8x128xf32>
    %14 = arith.addf %11, %13 : vector<8x128xf32>
    %cst_11 = arith.constant 0.000000e+00 : f32
    %15 = vector.broadcast %cst_11 : f32 to vector<8x128xf32>
    %16 = arith.maximumf %14, %15 : vector<8x128xf32>
    %17 = arith.truncf %16 : vector<8x128xf32> to vector<8x128xbf16>
    %c0_12 = arith.constant 0 : index
    %c0_13 = arith.constant 0 : index
    %18 = vector.load %arg6[%c0_12, %c0_13] : memref<128x128xbf16, #tpu.memory_space<vmem>>, vector<128x128xbf16>
    %cst_14 = arith.constant dense<0.000000e+00> : vector<8x128xf32>
    %19 = tpu.matmul %17, %18, %cst_14 {dimension_numbers = #tpu.dot_dimension_numbers<[1], [0], [0], [1], [0, 0, 1, 1], [], []>} : vector<8x128xbf16>, vector<128x128xbf16>, vector<8x128xf32> -> vector<8x128xf32>
    %c0_15 = arith.constant 0 : index
    %c0_16 = arith.constant 0 : index
    %20 = vector.load %arg7[%c0_15, %c0_16] : memref<1x128xf32, #tpu.memory_space<vmem>>, vector<1x128xf32>
    %21 = vector.broadcast %20 : vector<1x128xf32> to vector<8x128xf32>
    %22 = arith.addf %19, %21 : vector<8x128xf32>
    %23 = tpu.iota {dimensions = array<i32: 1>} : vector<8x128xi32>
    %c32_i32 = arith.constant 32 : i32
    %24 = vector.broadcast %c32_i32 : i32 to vector<8x128xi32>
    %25 = arith.cmpi sge, %23, %24 : vector<8x128xi32>
    %c64_i32 = arith.constant 64 : i32
    %26 = vector.broadcast %c64_i32 : i32 to vector<8x128xi32>
    %27 = arith.cmpi slt, %23, %26 : vector<8x128xi32>
    %28 = arith.andi %25, %27 : vector<8x128xi1>
    %29 = math.exp %22 : vector<8x128xf32>
    %cst_17 = arith.constant 9.99999996E-13 : f32
    %30 = vector.broadcast %cst_17 : f32 to vector<8x128xf32>
    %31 = arith.addf %29, %30 : vector<8x128xf32>
    %32 = arith.select %28, %31, %22 : vector<8x128xi1>, vector<8x128xf32>
    %c0_18 = arith.constant 0 : index
    %c0_19 = arith.constant 0 : index
    %33 = vector.load %arg8[%c0_18, %c0_19] : memref<8x128xf32, #tpu.memory_space<vmem>>, vector<8x128xf32>
    tpu.vector_store %arg8[%c0_18, %c0_19], %32 {strides = array<i32>} : memref<8x128xf32, #tpu.memory_space<vmem>>, vector<8x128xf32>,
    return
  }
  func.func @transform_0(%arg0: i32) -> (i32, i32) {
    %c0_i32 = arith.constant 0 : i32
    %c0_i32_0 = arith.constant 0 : i32
    return %arg0, %c0_i32 : i32, i32
  }
  func.func @transform_1(%arg0: i32) -> (i32, i32) {
    %c0_i32 = arith.constant 0 : i32
    %c0_i32_0 = arith.constant 0 : i32
    %c0_i32_1 = arith.constant 0 : i32
    return %c0_i32, %c0_i32_0 : i32, i32
  }
  func.func @transform_2(%arg0: i32) -> (i32, i32) {
    %c0_i32 = arith.constant 0 : i32
    %c0_i32_0 = arith.constant 0 : i32
    %c0_i32_1 = arith.constant 0 : i32
    return %c0_i32, %c0_i32_0 : i32, i32
  }
  func.func @transform_3(%arg0: i32) -> (i32, i32) {
    %c0_i32 = arith.constant 0 : i32
    %c0_i32_0 = arith.constant 0 : i32
    %c0_i32_1 = arith.constant 0 : i32
    return %c0_i32, %c0_i32_0 : i32, i32
  }
  func.func @transform_4(%arg0: i32) -> (i32, i32) {
    %c0_i32 = arith.constant 0 : i32
    %c0_i32_0 = arith.constant 0 : i32
    %c0_i32_1 = arith.constant 0 : i32
    return %c0_i32, %c0_i32_0 : i32, i32
  }
  func.func @transform_5(%arg0: i32) -> (i32, i32) {
    %c0_i32 = arith.constant 0 : i32
    %c0_i32_0 = arith.constant 0 : i32
    %c0_i32_1 = arith.constant 0 : i32
    return %c0_i32, %c0_i32_0 : i32, i32
  }
  func.func @transform_6(%arg0: i32) -> (i32, i32) {
    %c0_i32 = arith.constant 0 : i32
    %c0_i32_0 = arith.constant 0 : i32
    %c0_i32_1 = arith.constant 0 : i32
    return %c0_i32, %c0_i32_0 : i32, i32
  }
  func.func @transform_7(%arg0: i32) -> (i32, i32) {
    %c0_i32 = arith.constant 0 : i32
    %c0_i32_0 = arith.constant 0 : i32
    return %arg0, %c0_i32 : i32, i32
  }
}

</mosaic_0001>

<bundles_post_ra>
// kernel: tpu_custom_call.1
= control target key start
LH: loop header
LB: loop body
LE: loop exit
PB: predicated region body
PF: predicated region fallthrough
CT: control target
= control target key end

     0   :  { %12 = vsyncpa [#allocation3], 0  ;;  %s707_s0 = inlined_call_operand.hbm [shape: f32[8,8], index: 0, kind: input, shape index: {}]   ;;  %s708_s1 = inlined_call_operand.hbm [shape: bf16[8,128], index: 1, kind: input, shape index: {}]   ;;  %s709_s2 = inlined_call_operand.vmem [shape: f32[1,128], index: 2, kind: input, shape index: {}]   ;;  %s710_s3 = inlined_call_operand.hbm [shape: bf16[128,128], index: 3, kind: input, shape index: {}]   ;;  %s711_s4 = inlined_call_operand.vmem [shape: f32[1,128], index: 4, kind: input, shape index: {}]   ;;  %s712_s5 = inlined_call_operand.hbm [shape: bf16[128,128], index: 5, kind: input, shape index: {}]   ;;  %s713_s6 = inlined_call_operand.vmem [shape: f32[1,128], index: 6, kind: input, shape index: {}]   ;;  %s714_s7 = inlined_call_operand.hbm [shape: f32[8,128], index: 7, kind: output, shape index: {}]  }
   0x1   :  { %13 = vsyncpa [#allocation6], 0 }
   0x2   :  { %14 = vsyncpa [#allocation9], 0 }
   0x3   :  { %15 = vsyncpa [#allocation4], 0  ;;  %s611_s24 = smov [#allocation5]   ;;  %s612_s26 = smov [#allocation2]  }
   0x4   :  { %s32_s25 = sshll.u32 %s611_s24, 4  ;;  %s22_s27 = sshll.u32 %s612_s26, 4  ;;  %s33_s25 = int_to_ptr.vmem [resolvable:$true] %s32_s25  ;;  %s23_s27 = int_to_ptr.vmem [resolvable:$true] %s22_s27 }
   0x5   :  { %s511_s28 = scalar_lea.vmem %s33_s25, 64  ;;  %p516_p1 = scmp.lt.s32.totalorder %s33_s25, %s33_s25 }
   0x6   :  { %p512_p0 = scmp.ne.s32.totalorder %s33_s25, %s511_s28  ;;  %p517_p2 = scmp.lt.s32.totalorder %s511_s28, %s511_s28 }
   0x8   :  { %p518_p3 = por %p517_p2, %p516_p1 }
   0xa   :  { %p519_p4 = pnand %p518_p3, %p512_p0 }
   0xc   :  { %522 = shalt.err (!%p519_p4)
}
   0xd   :  { %35 = dma.hbm_to_vmem [thread:$0]  %s708_s1, 64, %s33_s25, [#allocation6]  }
   0xe   :  { %s531_s8 = scalar_lea.vmem %s23_s27, 128  ;;  %p536_p6 = scmp.lt.s32.totalorder %s23_s27, %s23_s27 }
   0xf   :  { %p532_p5 = scmp.ne.s32.totalorder %s23_s27, %s531_s8  ;;  %p537_p7 = scmp.lt.s32.totalorder %s531_s8, %s531_s8 }
  0x11   :  { %p538_p8 = por %p537_p7, %p536_p6 }
  0x13   :  { %p539_p9 = pnand %p538_p8, %p532_p5 }
  0x15   :  { %542 = shalt.err (!%p539_p9)
}
  0x16   :  { %25 = dma.hbm_to_vmem [thread:$0]  %s707_s0, 128, %s23_s27, [#allocation3]  }
  0x17   :  { %s613_s11 = smov [#allocation7]  }
  0x18   :  { %s43_s12 = sshll.u32 %s613_s11, 4  ;;  %s44_s12 = int_to_ptr.vmem [resolvable:$true] %s43_s12 }
  0x19   :  { %s551_s13 = scalar_lea.vmem %s44_s12, 1024  ;;  %p556_p11 = scmp.lt.s32.totalorder %s44_s12, %s44_s12 }
  0x1a   :  { %p552_p10 = scmp.ne.s32.totalorder %s44_s12, %s551_s13  ;;  %p557_p12 = scmp.lt.s32.totalorder %s551_s13, %s551_s13 }
  0x1c   :  { %p558_p13 = por %p557_p12, %p556_p11 }
  0x1e   :  { %p559_p0 = pnand %p558_p13, %p552_p10 }
  0x20   :  { %562 = shalt.err (!%p559_p0)
}
  0x21   :  { %s614_s1 = smov 64   ;;  %s615_s14 = smov 4  }
  0x22   :  { %49 = dma.hbm_to_vmem [thread:$0]  %s710_s3, 1024, %s44_s12, [#allocation6], %s614_s1, %s614_s1, %s615_s14  }
  0x23   :  { %s616_s17 = smov [#allocation8]  }
  0x24   :  { %s57_s18 = sshll.u32 %s616_s17, 4  ;;  %s58_s18 = int_to_ptr.vmem [resolvable:$true] %s57_s18 }
  0x25   :  { %s571_s0 = scalar_lea.vmem %s58_s18, 1024  ;;  %p576_p2 = scmp.lt.s32.totalorder %s58_s18, %s58_s18 }
  0x26   :  { %p572_p1 = scmp.ne.s32.totalorder %s58_s18, %s571_s0  ;;  %p577_p3 = scmp.lt.s32.totalorder %s571_s0, %s571_s0 }
  0x28   :  { %p578_p4 = por %p577_p3, %p576_p2 }
  0x2a   :  { %p579_p5 = pnand %p578_p4, %p572_p1 }
  0x2c   :  { %582 = shalt.err (!%p579_p5)
}
  0x2d   :  { %63 = dma.hbm_to_vmem [thread:$0]  %s712_s5, 1024, %s58_s18, [#allocation9], %s614_s1, %s614_s1, %s615_s14  }
  0x2e   :  { %603 = dma.done.wait [#allocation3], 128  }
  0x2f   :  { %604 = vsyncadd [#allocation3], 4294967168 }
  0x30   :  { %605 = dma.done.wait [#allocation6], 1088  }
  0x31   :  { %606 = vsyncadd [#allocation6], 4294966208 }
  0x32   :  { %607 = dma.done.wait [#allocation9], 1024  }
  0x33   :  { %608 = vsyncadd [#allocation9], 4294966272  ;;  %v617_v0 = vmov 0.0   ;;  %vm618_vm0 = vmmov 0   ;;  %vm93_vm1 = vcmask 1043456   ;;  %v79_v2 = vld [vmem:[#allocation2] sm:$0xff]  ;;  %v363_v44 = vlaneseq }
  0x34   :  { %430 = vmatprep.subr.bf16.mxu0 %v617_v0  ;;  %432 = vmatprep.mubr.msk.bf16.mxu0 %vm618_vm0, %v617_v0  ;;  %v81_v1 = vld [vmem:[#allocation5] sm:$0xf]  ;;  %v80_v4 = vpack.c.bf16 %v79_v2, %v79_v2  ;;  %vm89_vm2 = vcmask 64512   ;;  %v486_v6 = vld [vmem:[#allocation7 + $0x30] sm:$0xff]   ;;  %v487_v7 = vld [vmem:[#allocation7 + $0x28] sm:$0xff]  }
  0x35   :  { %436 = vmatprep.subr.bf16.mxu1 %v617_v0  ;;  %452 = vmatprep.mubr.msk.bf16.mxu1 %vm618_vm0, %v617_v0  ;;  %v95_v3 = vsel %vm93_vm1, %v81_v1, 0  ;;  %v485_v5 = vld [vmem:[#allocation7 + $0x38] sm:$0xff]   ;;  %v488_v8 = vld [vmem:[#allocation7 + $0x20] sm:$0xff]   ;;  %v490_v10 = vld [vmem:[#allocation7 + $0x10] sm:$0xff]   ;;  %v364_v45 = vand.u32 127, %v363_v44 }
  0x36   :  { %431 = vmatpush3.bf16.msra.mxu0 %v95_v3  ;;  %437 = vmatpush3.bf16.msra.mxu1 %v485_v5  ;;  %v489_v9 = vld [vmem:[#allocation7 + $0x18] sm:$0xff]   ;;  %v491_v11 = vld [vmem:[#allocation7 + $0x8] sm:$0xff]   ;;  %v492_v12 = vld [vmem:[#allocation7] sm:$0xff]  }
  0x37   :  { %456 = vmatprep.subr.bf16.mxu0 %v617_v0  ;;  %438 = vmatprep.subr.bf16.mxu1 %v617_v0  ;;  %v493_v13 = vld [vmem:[#allocation8 + $0x38] sm:$0xff]   ;;  %v494_v14 = vld [vmem:[#allocation8 + $0x30] sm:$0xff]   ;;  %v495_v15 = vld [vmem:[#allocation8 + $0x28] sm:$0xff]   ;;  %vm365_vm3 = vcmp.ge.s32.totalorder %v364_v45, 32  ;;  %vm366_vm4 = vcmp.lt.s32.totalorder %v364_v45, 64 }
  0x38   :  { %v496_v16 = vld [vmem:[#allocation8 + $0x20] sm:$0xff]   ;;  %v497_v17 = vld [vmem:[#allocation8 + $0x18] sm:$0xff]   ;;  %v498_v18 = vld [vmem:[#allocation8 + $0x10] sm:$0xff]  }
  0x39   :  { %433 = vmatmul.mubr.msk.bf16.vlgmr.msra.gmra.mxu0 %vm89_vm2, %v80_v4  ;;  %v390_v19 = vld [vmem:[%s709_s2] ss:$0 sm:$0xff]  ;;  %v499_v27 = vld [vmem:[#allocation8 + $0x8] sm:$0xff]   ;;  %v500_v28 = vld [vmem:[#allocation8] sm:$0xff]  }
  0x3a   :  { %472 = vmatprep.mubr.msk.bf16.mxu0 %vm618_vm0, %v617_v0  ;;  %439 = vmatpush3.bf16.msra.mxu1 %v486_v6  ;;  %v392_v29 = vld [vmem:[%s711_s4] ss:$0 sm:$0xff]  ;;  %s619_s4 = smov [#allocation10]   ;;  %vm367_vm5 = vmand %vm365_vm3, %vm366_vm4 }
  0x3b   :  { %440 = vmatprep.subr.bf16.mxu1 %v617_v0  ;;  %457 = vmatpush3.bf16.msra.mxu0 %v493_v13  ;;  %v401_v37 = vld [vmem:[%s713_s6] ss:$0 sm:$0xff]  ;;  %s379_s24 = sshll.u32 %s619_s4, 4  ;;  %s380_s24 = int_to_ptr.vmem [resolvable:$true] %s379_s24 }
  0x3c   :  { %458 = vmatprep.subr.bf16.mxu0 %v617_v0  ;;  %s583_s6 = scalar_lea.vmem %s380_s24, 128  ;;  %p588_p7 = scmp.lt.s32.totalorder %s380_s24, %s380_s24 }
  0x3d   :  { %p584_p6 = scmp.ne.s32.totalorder %s380_s24, %s583_s6  ;;  %p589_p8 = scmp.lt.s32.totalorder %s583_s6, %s583_s6 }
  0x3e   :  { %441 = vmatpush3.bf16.msra.mxu1 %v487_v7 }
  0x3f   :  { %442 = vmatprep.subr.bf16.mxu1 %v617_v0  ;;  %459 = vmatpush3.bf16.msra.mxu0 %v494_v14  ;;  %p590_p9 = por %p589_p8, %p588_p7 }
  0x40   :  { %460 = vmatprep.subr.bf16.mxu0 %v617_v0 }
  0x41   :  { %p591_p10 = pnand %p590_p9, %p584_p6 }
  0x42   :  { %443 = vmatpush3.bf16.msra.mxu1 %v488_v8 }
  0x43   :  { %444 = vmatprep.subr.bf16.mxu1 %v617_v0  ;;  %461 = vmatpush3.bf16.msra.mxu0 %v495_v15 }
  0x44   :  { %462 = vmatprep.subr.bf16.mxu0 %v617_v0 }
  0x46   :  { %445 = vmatpush3.bf16.msra.mxu1 %v489_v9 }
  0x47   :  { %446 = vmatprep.subr.bf16.mxu1 %v617_v0  ;;  %463 = vmatpush3.bf16.msra.mxu0 %v496_v16 }
  0x48   :  { %464 = vmatprep.subr.bf16.mxu0 %v617_v0 }
  0x4a   :  { %447 = vmatpush3.bf16.msra.mxu1 %v490_v10 }
  0x4b   :  { %448 = vmatprep.subr.bf16.mxu1 %v617_v0  ;;  %465 = vmatpush3.bf16.msra.mxu0 %v497_v17 }
  0x4c   :  { %466 = vmatprep.subr.bf16.mxu0 %v617_v0 }
  0x4e   :  { %449 = vmatpush3.bf16.msra.mxu1 %v491_v11 }
  0x4f   :  { %450 = vmatprep.subr.bf16.mxu1 %v617_v0  ;;  %467 = vmatpush3.bf16.msra.mxu0 %v498_v18 }
  0x50   :  { %468 = vmatprep.subr.bf16.mxu0 %v617_v0 }
  0x52   :  { %451 = vmatpush3.bf16.msra.mxu1 %v492_v12 }
  0x53   :  { %469 = vmatpush3.bf16.msra.mxu0 %v499_v27 }
  0x54   :  { %470 = vmatprep.subr.bf16.mxu0 %v617_v0 }
  0x57   :  { %471 = vmatpush3.bf16.msra.mxu0 %v500_v28 }
  0xf9   :  { %v131_v20 = vpop.f32.mrf.mxu0 }
  0xfa   :  { %v132_v21 = vadd.f32 %v390_v19, %v131_v20 }
  0xfb   :  { %v434_v22 = vpop.f32.mrf.mxu0 }
  0xfc   :  { %v137_v23 = vmax.f32 %v132_v21, 0.0 }
  0xfd   :  { %v134_v24 = vpop.f32.mrf.mxu0 }
  0xfe   :  { %v138_v25 = vpack.c.bf16 %v137_v23, %v137_v23 }
  0xff   :  { %v435_v26 = vpop.f32.mrf.mxu0 }
 0x100   :  { %453 = vmatmul.mubr.bf16.vlgmr.msra.gmra.mxu1 %v138_v25 }
 0x1c0   :  { %v244_v30 = vpop.f32.mrf.mxu1 }
 0x1c1   :  { %v245_v31 = vadd.f32 %v392_v29, %v244_v30 }
 0x1c2   :  { %v454_v32 = vpop.f32.mrf.mxu1 }
 0x1c3   :  { %v250_v33 = vmax.f32 %v245_v31, 0.0 }
 0x1c4   :  { %v247_v34 = vpop.f32.mrf.mxu1 }
 0x1c5   :  { %v251_v35 = vpack.c.bf16 %v250_v33, %v250_v33 }
 0x1c6   :  { %v455_v36 = vpop.f32.mrf.mxu1 }
 0x1c7   :  { %473 = vmatmul.mubr.bf16.vlgmr.msra.gmra.mxu0 %v251_v35 }
 0x287   :  { %v357_v38 = vpop.f32.mrf.mxu0 }
 0x288   :  { %v358_v39 = vadd.f32 %v401_v37, %v357_v38 }
 0x289   :  { %v474_v40 = vpop.f32.mrf.mxu0 }
 0x28a   :  { %v368_v41 = vmul.f32 1.442695, %v358_v39 }
 0x28b   :  { %v360_v42 = vpop.f32.mrf.mxu0 }
 0x28c   :  { %501 = vpow2.f32 %v368_v41 }
 0x28d   :  { %v475_v43 = vpop.f32.mrf.mxu0 }
 0x299   :  { %v502_v46 = vpop.eup %501 }
 0x29a   :  { %v370_v47 = vadd.f32 1e-12, %v502_v46 }
 0x29c   :  { %v371_v48 = vsel %vm367_vm5, %v370_v47, %v358_v39 }
 0x29d   :  { %372 = vst [vmem:[#allocation10] sm:$0xff] %v371_v48 }
 0x29e   :  { %594 = shalt.err (!%p591_p10)
}
 0x29f   :  { %382 = dma.vmem_to_hbm [thread:$0]  %s380_s24, 128, %s714_s7, [#allocation4]  }
 0x2a0   :  { %609 = dma.done.wait [#allocation4], 128  }
 0x2a1   :  { %610 = vsyncadd [#allocation4], 4294967168 }
 0x2a2   :  { %386 = vsyncpa [#allocation3], 1 }
 0x2a3   :  { %387 = vsyncpa [#allocation6], 1 }
 0x2a4   :  { %388 = vsyncpa [#allocation9], 1 }
 0x2a5   :  { %389 = vsyncpa [#allocation4], 1 }

</bundles_post_ra>
